<compile_context>
chip_gen: v7x
topology: tpu7x:2x2x1
jax: 0.10.0
libtpu: 0.0.40
codegen_flags: <defaults>
</compile_context>

<pallas_src>
import functools

import jax
import jax.numpy as jnp
from jax.experimental import pallas as pl
from jax.experimental.pallas import tpu as pltpu

_LANE = 128      # lane width (last dim)
_SUBLANE = 8     # sublane width (second-to-last dim, f32)
_BN_EPS = 1e-5


def _round_up(n, m):
    return (n + m - 1) // m * m


# ----------------------------- Pallas kernel -------------------------------

def _fused_mlp_kernel(*refs):
    """refs = (x_ref, w0, b0, w1, b1, ..., wN, bN, o_ref).

    Every layer is a lane-dense matmul + bias (BN already folded into W/b,
    Dropout is identity in eval mode, no activation in the reference
    Sequential).  Intermediates stay in vregs/VMEM; weights are resident
    across all batch-tile grid steps.
    """
    x_ref = refs[0]
    o_ref = refs[-1]
    wb_refs = refs[1:-1]

    h = x_ref[...]                                   # [TM, F] f32
    for i in range(0, len(wb_refs), 2):
        w = wb_refs[i][...]                          # [in, out_pad] bf16
        b = wb_refs[i + 1][...]                      # [1, out_pad]  f32
        h = jnp.dot(h.astype(w.dtype), w,
                    preferred_element_type=jnp.float32) + b
    o_ref[...] = h
    # TODO(synk): training-mode Dropout / batch-statistics BN / running-stat
    # updates are not implemented (eval-mode forward semantics only).


# ------------------------- parameter preparation ---------------------------

def fold_and_pad_params(hidden_params, out_params, num_features,
                        weight_dtype=jnp.bfloat16):
    """Fold eval-mode BatchNorm into each Linear, transpose to [in, out],
    lane-pad only the OUTPUT dim of each layer to 128 (contraction dims stay
    at the previous layer's (padded) width; layer 0 keeps F un-padded).

    Returns (flat_params, t_pad) where flat_params is
    [w0, b0, ..., w_out, b_out]; weights are `weight_dtype`, biases f32.
    """
    flat = []
    in_dim = num_features                    # contraction dim of next weight
    for p in hidden_params:
        h = p["w"].shape[0]
        in_true = p["w"].shape[1]
        h_pad = _round_up(h, _LANE)
        scale = p["gamma"] / jnp.sqrt(p["var"] + _BN_EPS)                 # [H]
        w_folded = p["w"].T * scale[None, :]                              # [in, H]
        b_folded = (p["b"] - p["mean"]) * scale + p["beta"]               # [H]
        w_p = jnp.zeros((in_dim, h_pad), jnp.float32).at[:in_true, :h].set(w_folded)
        b_p = jnp.zeros((1, h_pad), jnp.float32).at[0, :h].set(b_folded)
        flat += [w_p.astype(weight_dtype), b_p]
        in_dim = h_pad

    w_out, b_out = out_params
    t = w_out.shape[0]
    in_true = w_out.shape[1]
    t_pad = _round_up(t, _LANE)
    w_p = jnp.zeros((in_dim, t_pad), jnp.float32).at[:in_true, :t].set(w_out.T)
    b_p = jnp.zeros((1, t_pad), jnp.float32).at[0, :t].set(b_out)
    flat += [w_p.astype(weight_dtype), b_p]
    return flat, t_pad


# ------------------------------- forward ------------------------------------

@functools.partial(jax.jit, static_argnums=(2, 3))
def fully_connected_forward(x, flat_params, t_pad, num_targets):
    """x: [B, num_features] float32 -> [B, num_targets] float32."""
    B, F = x.shape
    # Batch tile: as large as useful (amortize ~0.35us/step), multiple of 8.
    tm = min(512, _round_up(B, _SUBLANE))
    grid = (pl.cdiv(B, tm),)

    x_spec = pl.BlockSpec((tm, F), lambda i: (i, 0))
    out_spec = pl.BlockSpec((tm, t_pad), lambda i: (i, 0))
    # Weights/biases: full-array blocks, constant index -> resident in VMEM.
    param_specs = [pl.BlockSpec(p.shape, lambda i: (0, 0)) for p in flat_params]

    # Explicit VMEM budget: resident weights + double-buffered x/out tiles +
    # a few intermediate activation buffers + headroom, capped for v7x.
    wb_bytes = sum(int(p.size) * p.dtype.itemsize for p in flat_params)
    h_pad_max = max(p.shape[-1] for p in flat_params)
    tile_bytes = 2 * (tm * F * 4 + tm * t_pad * 4)
    inter_bytes = 4 * tm * h_pad_max * 4
    vmem_limit = int(min(max(wb_bytes + tile_bytes + inter_bytes + (4 << 20),
                             16 << 20), 64 << 20))
    # TODO(synk): if wb_bytes alone exceeds ~40 MiB (v7x's 64 MiB VMEM), stream
    # weights layer-by-layer with pltpu.emit_pipeline instead of full residency.

    out_padded = pl.pallas_call(
        _fused_mlp_kernel,
        out_shape=jax.ShapeDtypeStruct((B, t_pad), jnp.float32),
        grid=grid,
        in_specs=[x_spec] + param_specs,
        out_specs=out_spec,
        compiler_params=pltpu.CompilerParams(
            dimension_semantics=("parallel",),
            vmem_limit_bytes=vmem_limit),
    )(x, *flat_params)

    return out_padded[:, :num_targets]


# --------------------------- parameter init ---------------------------------

def init_params(key, num_features, num_targets, num_layers, hidden_size):
    params = []
    fan_in = num_features
    for _ in range(num_layers):
        key, kw, kb = jax.random.split(key, 3)
        bound = 1.0 / jnp.sqrt(fan_in)
        w = jax.random.uniform(kw, (hidden_size, fan_in), jnp.float32, -bound, bound)
        b = jax.random.uniform(kb, (hidden_size,), jnp.float32, -bound, bound)
        bn = dict(gamma=jnp.ones((hidden_size,), jnp.float32),
                  beta=jnp.zeros((hidden_size,), jnp.float32),
                  mean=jnp.zeros((hidden_size,), jnp.float32),
                  var=jnp.ones((hidden_size,), jnp.float32))
        params.append(dict(w=w, b=b, **bn))
        fan_in = hidden_size
    key, kw, kb = jax.random.split(key, 3)
    bound = 1.0 / jnp.sqrt(fan_in)
    w_out = jax.random.uniform(kw, (num_targets, fan_in), jnp.float32, -bound, bound)
    b_out = jax.random.uniform(kb, (num_targets,), jnp.float32, -bound, bound)
    return params, (w_out, b_out)


# ------------------------------- main ---------------------------------------

if __name__ == "__main__":
    num_features = 32
    num_targets = 8
    num_layers = 3
    hidden_size = 32
    batch = 8

    key = jax.random.PRNGKey(0)
    key, kx, kp = jax.random.split(key, 3)
    x = jax.random.normal(kx, (batch, num_features), jnp.float32)
    hidden_params, out_params = init_params(
        kp, num_features, num_targets, num_layers, hidden_size)

    # One-time prep: fold BN into the linears, transpose, lane-pad output dims,
    # cast weights to bf16.
    flat_params, t_pad = fold_and_pad_params(
        hidden_params, out_params, num_features)

    y = fully_connected_forward(x, flat_params, t_pad, num_targets)
    y = jax.block_until_ready(y)

    # Reference check in plain JAX (eval-mode semantics, unfolded f32 path).
    ref = x
    for p in hidden_params:
        ref = ref @ p["w"].T + p["b"]
        ref = (ref - p["mean"]) / jnp.sqrt(p["var"] + _BN_EPS) * p["gamma"] + p["beta"]
    ref = ref @ out_params[0].T + out_params[1]

    assert y.shape == (batch, num_targets)
    # Tolerance loosened for bf16 weights/activations (f32 accumulation).
    assert jnp.allclose(y, ref, atol=5e-2, rtol=5e-2), (
        f"max abs err {jnp.max(jnp.abs(y - ref))}")

    print("KERNEL_OK")
</pallas_src>

<mosaic_0001>
module attributes {stable_mosaic.version = 11 : i64} {
  func.func @_fused_mlp_kernel(%arg0: i32, %arg1: memref<8x32xf32, #tpu.memory_space<vmem>>, %arg2: memref<32x128xbf16, #tpu.memory_space<vmem>>, %arg3: memref<1x128xf32, #tpu.memory_space<vmem>>, %arg4: memref<128x128xbf16, #tpu.memory_space<vmem>>, %arg5: memref<1x128xf32, #tpu.memory_space<vmem>>, %arg6: memref<128x128xbf16, #tpu.memory_space<vmem>>, %arg7: memref<1x128xf32, #tpu.memory_space<vmem>>, %arg8: memref<128x128xbf16, #tpu.memory_space<vmem>>, %arg9: memref<1x128xf32, #tpu.memory_space<vmem>>, %arg10: memref<8x128xf32, #tpu.memory_space<vmem>>) attributes {dimension_semantics = [#tpu.dimension_semantics<parallel>], iteration_bounds = array<i64: 1>, scalar_prefetch = 0 : i64, scratch_operands = 0 : i64, tpu.core_type = #tpu.core_type<tc>, window_params = [{transform_indices = @transform_0, window_bounds = array<i64: 8, 32>}, {pipeline_mode = #tpu.pipeline_mode<synchronous>, transform_indices = @transform_1, window_bounds = array<i64: 32, 128>}, {pipeline_mode = #tpu.pipeline_mode<synchronous>, transform_indices = @transform_2, window_bounds = array<i64: 1, 128>}, {pipeline_mode = #tpu.pipeline_mode<synchronous>, transform_indices = @transform_3, window_bounds = array<i64: 128, 128>}, {pipeline_mode = #tpu.pipeline_mode<synchronous>, transform_indices = @transform_4, window_bounds = array<i64: 1, 128>}, {pipeline_mode = #tpu.pipeline_mode<synchronous>, transform_indices = @transform_5, window_bounds = array<i64: 128, 128>}, {pipeline_mode = #tpu.pipeline_mode<synchronous>, transform_indices = @transform_6, window_bounds = array<i64: 1, 128>}, {pipeline_mode = #tpu.pipeline_mode<synchronous>, transform_indices = @transform_7, window_bounds = array<i64: 128, 128>}, {pipeline_mode = #tpu.pipeline_mode<synchronous>, transform_indices = @transform_8, window_bounds = array<i64: 1, 128>}, {transform_indices = @transform_9, window_bounds = array<i64: 8, 128>}]} {
    %c0 = arith.constant 0 : index
    %c0_0 = arith.constant 0 : index
    %0 = vector.load %arg1[%c0, %c0_0] : memref<8x32xf32, #tpu.memory_space<vmem>>, vector<8x32xf32>
    %c0_1 = arith.constant 0 : index
    %c0_2 = arith.constant 0 : index
    %1 = vector.load %arg2[%c0_1, %c0_2] : memref<32x128xbf16, #tpu.memory_space<vmem>>, vector<32x128xbf16>
    %c0_3 = arith.constant 0 : index
    %c0_4 = arith.constant 0 : index
    %2 = vector.load %arg3[%c0_3, %c0_4] : memref<1x128xf32, #tpu.memory_space<vmem>>, vector<1x128xf32>
    %3 = arith.truncf %0 : vector<8x32xf32> to vector<8x32xbf16>
    %cst = arith.constant dense<0.000000e+00> : vector<8x128xf32>
    %4 = tpu.matmul %3, %1, %cst {dimension_numbers = #tpu.dot_dimension_numbers<[1], [0], [0], [1], [0, 0, 1, 1], [], []>} : vector<8x32xbf16>, vector<32x128xbf16>, vector<8x128xf32> -> vector<8x128xf32>
    %5 = vector.broadcast %2 : vector<1x128xf32> to vector<8x128xf32>
    %6 = arith.addf %4, %5 : vector<8x128xf32>
    %c0_5 = arith.constant 0 : index
    %c0_6 = arith.constant 0 : index
    %7 = vector.load %arg4[%c0_5, %c0_6] : memref<128x128xbf16, #tpu.memory_space<vmem>>, vector<128x128xbf16>
    %c0_7 = arith.constant 0 : index
    %c0_8 = arith.constant 0 : index
    %8 = vector.load %arg5[%c0_7, %c0_8] : memref<1x128xf32, #tpu.memory_space<vmem>>, vector<1x128xf32>
    %9 = arith.truncf %6 : vector<8x128xf32> to vector<8x128xbf16>
    %cst_9 = arith.constant dense<0.000000e+00> : vector<8x128xf32>
    %10 = tpu.matmul %9, %7, %cst_9 {dimension_numbers = #tpu.dot_dimension_numbers<[1], [0], [0], [1], [0, 0, 1, 1], [], []>} : vector<8x128xbf16>, vector<128x128xbf16>, vector<8x128xf32> -> vector<8x128xf32>
    %11 = vector.broadcast %8 : vector<1x128xf32> to vector<8x128xf32>
    %12 = arith.addf %10, %11 : vector<8x128xf32>
    %c0_10 = arith.constant 0 : index
    %c0_11 = arith.constant 0 : index
    %13 = vector.load %arg6[%c0_10, %c0_11] : memref<128x128xbf16, #tpu.memory_space<vmem>>, vector<128x128xbf16>
    %c0_12 = arith.constant 0 : index
    %c0_13 = arith.constant 0 : index
    %14 = vector.load %arg7[%c0_12, %c0_13] : memref<1x128xf32, #tpu.memory_space<vmem>>, vector<1x128xf32>
    %15 = arith.truncf %12 : vector<8x128xf32> to vector<8x128xbf16>
    %cst_14 = arith.constant dense<0.000000e+00> : vector<8x128xf32>
    %16 = tpu.matmul %15, %13, %cst_14 {dimension_numbers = #tpu.dot_dimension_numbers<[1], [0], [0], [1], [0, 0, 1, 1], [], []>} : vector<8x128xbf16>, vector<128x128xbf16>, vector<8x128xf32> -> vector<8x128xf32>
    %17 = vector.broadcast %14 : vector<1x128xf32> to vector<8x128xf32>
    %18 = arith.addf %16, %17 : vector<8x128xf32>
    %c0_15 = arith.constant 0 : index
    %c0_16 = arith.constant 0 : index
    %19 = vector.load %arg8[%c0_15, %c0_16] : memref<128x128xbf16, #tpu.memory_space<vmem>>, vector<128x128xbf16>
    %c0_17 = arith.constant 0 : index
    %c0_18 = arith.constant 0 : index
    %20 = vector.load %arg9[%c0_17, %c0_18] : memref<1x128xf32, #tpu.memory_space<vmem>>, vector<1x128xf32>
    %21 = arith.truncf %18 : vector<8x128xf32> to vector<8x128xbf16>
    %cst_19 = arith.constant dense<0.000000e+00> : vector<8x128xf32>
    %22 = tpu.matmul %21, %19, %cst_19 {dimension_numbers = #tpu.dot_dimension_numbers<[1], [0], [0], [1], [0, 0, 1, 1], [], []>} : vector<8x128xbf16>, vector<128x128xbf16>, vector<8x128xf32> -> vector<8x128xf32>
    %23 = vector.broadcast %20 : vector<1x128xf32> to vector<8x128xf32>
    %24 = arith.addf %22, %23 : vector<8x128xf32>
    %c0_20 = arith.constant 0 : index
    %c0_21 = arith.constant 0 : index
    %25 = vector.load %arg10[%c0_20, %c0_21] : memref<8x128xf32, #tpu.memory_space<vmem>>, vector<8x128xf32>
    tpu.vector_store %arg10[%c0_20, %c0_21], %24 {strides = array<i32>} : memref<8x128xf32, #tpu.memory_space<vmem>>, vector<8x128xf32>,
    return
  }
  func.func @transform_0(%arg0: i32) -> (i32, i32) {
    %c0_i32 = arith.constant 0 : i32
    %c0_i32_0 = arith.constant 0 : i32
    return %arg0, %c0_i32 : i32, i32
  }
  func.func @transform_1(%arg0: i32) -> (i32, i32) {
    %c0_i32 = arith.constant 0 : i32
    %c0_i32_0 = arith.constant 0 : i32
    %c0_i32_1 = arith.constant 0 : i32
    return %c0_i32, %c0_i32_0 : i32, i32
  }
  func.func @transform_2(%arg0: i32) -> (i32, i32) {
    %c0_i32 = arith.constant 0 : i32
    %c0_i32_0 = arith.constant 0 : i32
    %c0_i32_1 = arith.constant 0 : i32
    return %c0_i32, %c0_i32_0 : i32, i32
  }
  func.func @transform_3(%arg0: i32) -> (i32, i32) {
    %c0_i32 = arith.constant 0 : i32
    %c0_i32_0 = arith.constant 0 : i32
    %c0_i32_1 = arith.constant 0 : i32
    return %c0_i32, %c0_i32_0 : i32, i32
  }
  func.func @transform_4(%arg0: i32) -> (i32, i32) {
    %c0_i32 = arith.constant 0 : i32
    %c0_i32_0 = arith.constant 0 : i32
    %c0_i32_1 = arith.constant 0 : i32
    return %c0_i32, %c0_i32_0 : i32, i32
  }
  func.func @transform_5(%arg0: i32) -> (i32, i32) {
    %c0_i32 = arith.constant 0 : i32
    %c0_i32_0 = arith.constant 0 : i32
    %c0_i32_1 = arith.constant 0 : i32
    return %c0_i32, %c0_i32_0 : i32, i32
  }
  func.func @transform_6(%arg0: i32) -> (i32, i32) {
    %c0_i32 = arith.constant 0 : i32
    %c0_i32_0 = arith.constant 0 : i32
    %c0_i32_1 = arith.constant 0 : i32
    return %c0_i32, %c0_i32_0 : i32, i32
  }
  func.func @transform_7(%arg0: i32) -> (i32, i32) {
    %c0_i32 = arith.constant 0 : i32
    %c0_i32_0 = arith.constant 0 : i32
    %c0_i32_1 = arith.constant 0 : i32
    return %c0_i32, %c0_i32_0 : i32, i32
  }
  func.func @transform_8(%arg0: i32) -> (i32, i32) {
    %c0_i32 = arith.constant 0 : i32
    %c0_i32_0 = arith.constant 0 : i32
    %c0_i32_1 = arith.constant 0 : i32
    return %c0_i32, %c0_i32_0 : i32, i32
  }
  func.func @transform_9(%arg0: i32) -> (i32, i32) {
    %c0_i32 = arith.constant 0 : i32
    %c0_i32_0 = arith.constant 0 : i32
    return %arg0, %c0_i32 : i32, i32
  }
}

</mosaic_0001>

<bundles_post_ra>
// kernel: fully_connected_forward.1
= control target key start
LH: loop header
LB: loop body
LE: loop exit
PB: predicated region body
PF: predicated region fallthrough
CT: control target
= control target key end

     0   :  { %14 = vsyncpa [#allocation3], 0  ;;  %s1018_s0 = inlined_call_operand.hbm [shape: f32[8,32], index: 0, kind: input, shape index: {}]   ;;  %s1019_s1 = inlined_call_operand.hbm [shape: bf16[32,128], index: 1, kind: input, shape index: {}]   ;;  %s1020_s2 = inlined_call_operand.vmem [shape: f32[1,128], index: 2, kind: input, shape index: {}]   ;;  %s1021_s3 = inlined_call_operand.hbm [shape: bf16[128,128], index: 3, kind: input, shape index: {}]   ;;  %s1022_s4 = inlined_call_operand.vmem [shape: f32[1,128], index: 4, kind: input, shape index: {}]   ;;  %s1023_s5 = inlined_call_operand.hbm [shape: bf16[128,128], index: 5, kind: input, shape index: {}]   ;;  %s1024_s6 = inlined_call_operand.vmem [shape: f32[1,128], index: 6, kind: input, shape index: {}]   ;;  %s1025_s7 = inlined_call_operand.hbm [shape: bf16[128,128], index: 7, kind: input, shape index: {}]   ;;  %s1026_s8 = inlined_call_operand.vmem [shape: f32[1,128], index: 8, kind: input, shape index: {}]   ;;  %s1027_s9 = inlined_call_operand.hbm [shape: f32[8,128], index: 9, kind: output, shape index: {}]  }
   0x1   :  { %15 = vsyncpa [#allocation6], 0 }
   0x2   :  { %16 = vsyncpa [#allocation9], 0 }
   0x3   :  { %17 = vsyncpa [#allocation4], 0  ;;  %s828_s30 = smov [#allocation5]   ;;  %s688_s13 = scalar_lea.hbm %s1019_s1, 256 }
   0x4   :  { %s33_s10 = sshll.u32 %s828_s30, 4  ;;  %p689_p0 = scmp.ne.s32.totalorder %s1019_s1, %s688_s13  ;;  %s34_s10 = int_to_ptr.vmem [resolvable:$true] %s33_s10 }
   0x5   :  { %p692_p1 = scmp.lt.u32.totalorder %s688_s13, %s1019_s1 }
   0x7   :  { %p694_p2 = pnand %p692_p1, %p689_p0 }
   0x9   :  { %697 = shalt.err (!%p694_p2)
}
   0xa   :  { %s698_s18 = scalar_lea.vmem %s34_s10, 256  ;;  %p703_p4 = scmp.lt.s32.totalorder %s34_s10, %s34_s10 }
   0xb   :  { %p699_p3 = scmp.ne.s32.totalorder %s34_s10, %s698_s18  ;;  %p704_p5 = scmp.lt.s32.totalorder %s698_s18, %s698_s18 }
   0xd   :  { %p705_p6 = por %p704_p5, %p703_p4 }
   0xf   :  { %p706_p7 = pnand %p705_p6, %p699_p3 }
  0x11   :  { %709 = shalt.err (!%p706_p7)
}
  0x12   :  { %s829_s19 = smov 64   ;;  %s830_s20 = smov 4  }
  0x13   :  { %39 = dma.hbm_to_vmem [thread:$0]  %s1019_s1, 256, %s34_s10, [#allocation6], %s829_s19, %s829_s19, %s830_s20  }
  0x14   :  { %s831_s23 = smov [#allocation8]   ;;  %s832_s25 = smov [#allocation2]  }
  0x15   :  { %s61_s24 = sshll.u32 %s831_s23, 4  ;;  %s24_s26 = sshll.u32 %s832_s25, 4  ;;  %s62_s24 = int_to_ptr.vmem [resolvable:$true] %s61_s24  ;;  %s25_s26 = int_to_ptr.vmem [resolvable:$true] %s24_s26 }
  0x16   :  { %s710_s29 = scalar_lea.hbm %s1023_s5, 1024 }
  0x17   :  { %p711_p8 = scmp.ne.s32.totalorder %s1023_s5, %s710_s29  ;;  %p714_p9 = scmp.lt.u32.totalorder %s710_s29, %s1023_s5 }
  0x19   :  { %p716_p10 = pnand %p714_p9, %p711_p8 }
  0x1b   :  { %719 = shalt.err (!%p716_p10)
}
  0x1c   :  { %s720_s1 = scalar_lea.vmem %s62_s24, 1024  ;;  %p725_p12 = scmp.lt.s32.totalorder %s62_s24, %s62_s24 }
  0x1d   :  { %p721_p11 = scmp.ne.s32.totalorder %s62_s24, %s720_s1  ;;  %p726_p13 = scmp.lt.s32.totalorder %s720_s1, %s720_s1 }
  0x1f   :  { %p727_p0 = por %p726_p13, %p725_p12 }
  0x21   :  { %p728_p1 = pnand %p727_p0, %p721_p11 }
  0x23   :  { %731 = shalt.err (!%p728_p1)
}
  0x24   :  { %67 = dma.hbm_to_vmem [thread:$0]  %s1023_s5, 1024, %s62_s24, [#allocation9], %s829_s19, %s829_s19, %s830_s20  }
  0x25   :  { %s732_s17 = scalar_lea.hbm %s1018_s0, 128 }
  0x26   :  { %p733_p2 = scmp.ne.s32.totalorder %s1018_s0, %s732_s17  ;;  %p736_p3 = scmp.lt.u32.totalorder %s732_s17, %s1018_s0 }
  0x28   :  { %p738_p4 = pnand %p736_p3, %p733_p2 }
  0x2a   :  { %741 = shalt.err (!%p738_p4)
}
  0x2b   :  { %s742_s25 = scalar_lea.vmem %s25_s26, 128  ;;  %p747_p6 = scmp.lt.s32.totalorder %s25_s26, %s25_s26 }
  0x2c   :  { %p743_p5 = scmp.ne.s32.totalorder %s25_s26, %s742_s25  ;;  %p748_p7 = scmp.lt.s32.totalorder %s742_s25, %s742_s25 }
  0x2e   :  { %p749_p8 = por %p748_p7, %p747_p6 }
  0x30   :  { %p750_p9 = pnand %p749_p8, %p743_p5 }
  0x32   :  { %753 = shalt.err (!%p750_p9)
}
  0x33   :  { %27 = dma.hbm_to_vmem [thread:$0]  %s1018_s0, 128, %s25_s26, [#allocation3]  }
  0x34   :  { %s833_s27 = smov [#allocation7]   ;;  %s834_s29 = smov [#allocation10]  }
  0x35   :  { %s47_s28 = sshll.u32 %s833_s27, 4  ;;  %s75_s30 = sshll.u32 %s834_s29, 4  ;;  %s48_s28 = int_to_ptr.vmem [resolvable:$true] %s47_s28  ;;  %s76_s30 = int_to_ptr.vmem [resolvable:$true] %s75_s30 }
  0x36   :  { %s754_s13 = scalar_lea.hbm %s1021_s3, 1024 }
  0x37   :  { %p755_p10 = scmp.ne.s32.totalorder %s1021_s3, %s754_s13  ;;  %p758_p11 = scmp.lt.u32.totalorder %s754_s13, %s1021_s3 }
  0x39   :  { %p760_p12 = pnand %p758_p11, %p755_p10 }
  0x3b   :  { %763 = shalt.err (!%p760_p12)
}
  0x3c   :  { %s764_s0 = scalar_lea.vmem %s48_s28, 1024  ;;  %p769_p0 = scmp.lt.s32.totalorder %s48_s28, %s48_s28 }
  0x3d   :  { %p765_p13 = scmp.ne.s32.totalorder %s48_s28, %s764_s0  ;;  %p770_p1 = scmp.lt.s32.totalorder %s764_s0, %s764_s0 }
  0x3f   :  { %p771_p2 = por %p770_p1, %p769_p0 }
  0x41   :  { %p772_p3 = pnand %p771_p2, %p765_p13 }
  0x43   :  { %775 = shalt.err (!%p772_p3)
}
  0x44   :  { %53 = dma.hbm_to_vmem [thread:$0]  %s1021_s3, 1024, %s48_s28, [#allocation6], %s829_s19, %s829_s19, %s830_s20  }
  0x45   :  { %s776_s21 = scalar_lea.hbm %s1025_s7, 1024 }
  0x46   :  { %p777_p4 = scmp.ne.s32.totalorder %s1025_s7, %s776_s21  ;;  %p780_p5 = scmp.lt.u32.totalorder %s776_s21, %s1025_s7 }
  0x48   :  { %p782_p6 = pnand %p780_p5, %p777_p4 }
  0x4a   :  { %785 = shalt.err (!%p782_p6)
}
  0x4b   :  { %s786_s24 = scalar_lea.vmem %s76_s30, 1024  ;;  %p791_p8 = scmp.lt.s32.totalorder %s76_s30, %s76_s30 }
  0x4c   :  { %p787_p7 = scmp.ne.s32.totalorder %s76_s30, %s786_s24  ;;  %p792_p9 = scmp.lt.s32.totalorder %s786_s24, %s786_s24 }
  0x4e   :  { %p793_p10 = por %p792_p9, %p791_p8 }
  0x50   :  { %p794_p11 = pnand %p793_p10, %p787_p7 }
  0x52   :  { %797 = shalt.err (!%p794_p11)
}
  0x53   :  { %81 = dma.hbm_to_vmem [thread:$0]  %s1025_s7, 1024, %s76_s30, [#allocation9], %s829_s19, %s829_s19, %s830_s20  }
  0x54   :  { %820 = dma.done.wait [#allocation3], 128  }
  0x55   :  { %821 = vsyncadd [#allocation3], 4294967168 }
  0x56   :  { %822 = dma.done.wait [#allocation6], 1280  }
  0x57   :  { %823 = vsyncadd [#allocation6], 4294966016 }
  0x58   :  { %824 = dma.done.wait [#allocation9], 2048  }
  0x59   :  { %825 = vsyncadd [#allocation9], 4294965248  ;;  %v835_v0 = vmov 0.0   ;;  %vm836_vm0 = vmmov 0   ;;  %v662_v1 = vld [vmem:[#allocation5] sm:$0xff]   ;;  %v663_v2 = vld [vmem:[#allocation5 + $0x8] sm:$0xff]  }
  0x5a   :  { %584 = vmatprep.subr.bf16.mxu0 %v835_v0  ;;  %588 = vmatprep.mubr.msk.bf16.mxu0 %vm836_vm0, %v835_v0  ;;  %v100_v3 = vld [vmem:[#allocation2] sm:$0xff]  ;;  %v664_v4 = vld [vmem:[#allocation7] sm:$0xff]   ;;  %vm125_vm1 = vcmask 261120   ;;  %v666_v7 = vld [vmem:[#allocation7 + $0x10] sm:$0xff]   ;;  %s837_s11 = smov [#allocation11]  }
  0x5b   :  { %592 = vmatprep.subr.bf16.mxu1 %v835_v0  ;;  %608 = vmatprep.mubr.msk.bf16.mxu1 %vm836_vm0, %v835_v0  ;;  %v106_v5 = vpack.c.bf16 %v100_v3, %v100_v3  ;;  %v665_v6 = vld [vmem:[#allocation7 + $0x8] sm:$0xff]   ;;  %v667_v8 = vld [vmem:[#allocation7 + $0x18] sm:$0xff]   ;;  %v668_v9 = vld [vmem:[#allocation7 + $0x20] sm:$0xff]   ;;  %s512_s12 = sshll.u32 %s837_s11, 4  ;;  %s513_s12 = int_to_ptr.vmem [resolvable:$true] %s512_s12 }
  0x5c   :  { %585 = vmatpush3.bf16.msra.mxu0 %v662_v1  ;;  %593 = vmatpush3.bf16.msra.mxu1 %v664_v4  ;;  %v669_v10 = vld [vmem:[#allocation7 + $0x28] sm:$0xff]   ;;  %v670_v11 = vld [vmem:[#allocation7 + $0x30] sm:$0xff]   ;;  %v671_v12 = vld [vmem:[#allocation7 + $0x38] sm:$0xff]   ;;  %p803_p13 = scmp.lt.s32.totalorder %s513_s12, %s513_s12 }
  0x5d   :  { %586 = vmatprep.subr.bf16.mxu0 %v835_v0  ;;  %594 = vmatprep.subr.bf16.mxu1 %v835_v0  ;;  %v672_v13 = vld [vmem:[#allocation8] sm:$0xff]   ;;  %v673_v14 = vld [vmem:[#allocation8 + $0x8] sm:$0xff]   ;;  %v674_v15 = vld [vmem:[#allocation8 + $0x10] sm:$0xff]  }
  0x5e   :  { %v675_v16 = vld [vmem:[#allocation8 + $0x18] sm:$0xff]   ;;  %v676_v17 = vld [vmem:[#allocation8 + $0x20] sm:$0xff]   ;;  %v677_v18 = vld [vmem:[#allocation8 + $0x28] sm:$0xff]  }
  0x5f   :  { %v678_v19 = vld [vmem:[#allocation8 + $0x30] sm:$0xff]   ;;  %v523_v20 = vld [vmem:[%s1020_s2] ss:$0 sm:$0xff]  ;;  %v679_v27 = vld [vmem:[#allocation8 + $0x38] sm:$0xff]  }
  0x60   :  { %587 = vmatpush3.bf16.msra.mxu0 %v663_v2  ;;  %595 = vmatpush3.bf16.msra.mxu1 %v665_v6  ;;  %v680_v28 = vld [vmem:[#allocation10] sm:$0xff]   ;;  %v681_v29 = vld [vmem:[#allocation10 + $0x8] sm:$0xff]   ;;  %v682_v30 = vld [vmem:[#allocation10 + $0x10] sm:$0xff]  }
  0x61   :  { %612 = vmatprep.subr.bf16.mxu0 %v835_v0  ;;  %596 = vmatprep.subr.bf16.mxu1 %v835_v0  ;;  %v683_v31 = vld [vmem:[#allocation10 + $0x18] sm:$0xff]   ;;  %v684_v32 = vld [vmem:[#allocation10 + $0x20] sm:$0xff]   ;;  %v685_v33 = vld [vmem:[#allocation10 + $0x28] sm:$0xff]  }
  0x62   :  { %v686_v34 = vld [vmem:[#allocation10 + $0x30] sm:$0xff]   ;;  %v527_v35 = vld [vmem:[%s1022_s4] ss:$0 sm:$0xff]  ;;  %v687_v42 = vld [vmem:[#allocation10 + $0x38] sm:$0xff]  }
  0x63   :  { %589 = vmatmul.mubr.msk.bf16.vlgmr.msra.gmra.mrb[0].mxu0 %vm125_vm1, %v106_v5  ;;  %v536_v43 = vld [vmem:[%s1024_s6] ss:$0 sm:$0xff]  ;;  %s798_s6 = scalar_lea.vmem %s513_s12, 128 }
  0x64   :  { %628 = vmatprep.mubr.msk.bf16.mxu0 %vm836_vm0, %v835_v0  ;;  %597 = vmatpush3.bf16.msra.mxu1 %v666_v7  ;;  %v545_v50 = vld [vmem:[%s1026_s8] ss:$0 sm:$0xff]  ;;  %p799_p12 = scmp.ne.s32.totalorder %s513_s12, %s798_s6  ;;  %p804_p0 = scmp.lt.s32.totalorder %s798_s6, %s798_s6 }
  0x65   :  { %598 = vmatprep.subr.bf16.mxu1 %v835_v0  ;;  %613 = vmatpush3.bf16.msra.mxu0 %v672_v13 }
  0x66   :  { %614 = vmatprep.subr.bf16.mxu0 %v835_v0  ;;  %p805_p1 = por %p804_p0, %p803_p13 }
  0x68   :  { %599 = vmatpush3.bf16.msra.mxu1 %v667_v8  ;;  %p806_p2 = pnand %p805_p1, %p799_p12 }
  0x69   :  { %600 = vmatprep.subr.bf16.mxu1 %v835_v0  ;;  %615 = vmatpush3.bf16.msra.mxu0 %v673_v14 }
  0x6a   :  { %616 = vmatprep.subr.bf16.mxu0 %v835_v0 }
  0x6c   :  { %601 = vmatpush3.bf16.msra.mxu1 %v668_v9 }
  0x6d   :  { %602 = vmatprep.subr.bf16.mxu1 %v835_v0  ;;  %617 = vmatpush3.bf16.msra.mxu0 %v674_v15 }
  0x6e   :  { %618 = vmatprep.subr.bf16.mxu0 %v835_v0 }
  0x70   :  { %603 = vmatpush3.bf16.msra.mxu1 %v669_v10 }
  0x71   :  { %604 = vmatprep.subr.bf16.mxu1 %v835_v0  ;;  %619 = vmatpush3.bf16.msra.mxu0 %v675_v16 }
  0x72   :  { %620 = vmatprep.subr.bf16.mxu0 %v835_v0 }
  0x74   :  { %605 = vmatpush3.bf16.msra.mxu1 %v670_v11 }
  0x75   :  { %606 = vmatprep.subr.bf16.mxu1 %v835_v0  ;;  %621 = vmatpush3.bf16.msra.mxu0 %v676_v17 }
  0x76   :  { %622 = vmatprep.subr.bf16.mxu0 %v835_v0 }
  0x78   :  { %607 = vmatpush3.bf16.msra.mxu1 %v671_v12 }
  0x79   :  { %632 = vmatprep.subr.bf16.mxu1 %v835_v0  ;;  %623 = vmatpush3.bf16.msra.mxu0 %v677_v18 }
  0x7a   :  { %624 = vmatprep.subr.bf16.mxu0 %v835_v0 }
  0x7d   :  { %625 = vmatpush3.bf16.msra.mxu0 %v678_v19 }
  0x7e   :  { %626 = vmatprep.subr.bf16.mxu0 %v835_v0 }
  0x81   :  { %627 = vmatpush3.bf16.msra.mxu0 %v679_v27 }
 0x136   :  { %v163_v21 = vpop.f32.mrb[0].mxu0 }
 0x137   :  { %v164_v22 = vadd.f32 %v523_v20, %v163_v21  ;;  %v590_v23 = vpop.f32.mrb[1].mxu0 }
 0x138   :  { %v166_v24 = vpop.f32.mrb[2].mxu0 }
 0x139   :  { %v186_v25 = vpack.c.bf16 %v164_v22, %v164_v22  ;;  %v591_v26 = vpop.f32.mrb[3].mxu0 }
 0x13b   :  { %609 = vmatmul.mubr.bf16.vlgmr.msra.gmra.mrb[0].mxu1 %v186_v25 }
 0x13c   :  { %648 = vmatprep.mubr.msk.bf16.mxu1 %vm836_vm0, %v835_v0  ;;  %633 = vmatpush3.bf16.msra.mxu1 %v680_v28 }
 0x13d   :  { %634 = vmatprep.subr.bf16.mxu1 %v835_v0 }
 0x140   :  { %635 = vmatpush3.bf16.msra.mxu1 %v681_v29 }
 0x141   :  { %636 = vmatprep.subr.bf16.mxu1 %v835_v0 }
 0x144   :  { %637 = vmatpush3.bf16.msra.mxu1 %v682_v30 }
 0x145   :  { %638 = vmatprep.subr.bf16.mxu1 %v835_v0 }
 0x148   :  { %639 = vmatpush3.bf16.msra.mxu1 %v683_v31 }
 0x149   :  { %640 = vmatprep.subr.bf16.mxu1 %v835_v0 }
 0x14c   :  { %641 = vmatpush3.bf16.msra.mxu1 %v684_v32 }
 0x14d   :  { %642 = vmatprep.subr.bf16.mxu1 %v835_v0 }
 0x150   :  { %643 = vmatpush3.bf16.msra.mxu1 %v685_v33 }
 0x151   :  { %644 = vmatprep.subr.bf16.mxu1 %v835_v0 }
 0x154   :  { %645 = vmatpush3.bf16.msra.mxu1 %v686_v34 }
 0x155   :  { %646 = vmatprep.subr.bf16.mxu1 %v835_v0 }
 0x158   :  { %647 = vmatpush3.bf16.msra.mxu1 %v687_v42 }
 0x20e   :  { %v275_v36 = vpop.f32.mrb[0].mxu1 }
 0x20f   :  { %v276_v37 = vadd.f32 %v527_v35, %v275_v36  ;;  %v610_v38 = vpop.f32.mrb[1].mxu1 }
 0x210   :  { %v278_v39 = vpop.f32.mrb[2].mxu1 }
 0x211   :  { %v298_v40 = vpack.c.bf16 %v276_v37, %v276_v37  ;;  %v611_v41 = vpop.f32.mrb[3].mxu1 }
 0x213   :  { %629 = vmatmul.mubr.bf16.vlgmr.msra.gmra.mrb[4].mxu0 %v298_v40 }
 0x2e6   :  { %v387_v44 = vpop.f32.mrb[4].mxu0 }
 0x2e7   :  { %v388_v45 = vadd.f32 %v536_v43, %v387_v44  ;;  %v630_v46 = vpop.f32.mrb[5].mxu0 }
 0x2e8   :  { %v390_v47 = vpop.f32.mrb[6].mxu0 }
 0x2e9   :  { %v410_v48 = vpack.c.bf16 %v388_v45, %v388_v45  ;;  %v631_v49 = vpop.f32.mrb[7].mxu0 }
 0x2eb   :  { %649 = vmatmul.mubr.bf16.vlgmr.msra.gmra.mrb[4].mxu1 %v410_v48 }
 0x3be   :  { %v499_v51 = vpop.f32.mrb[4].mxu1 }
 0x3bf   :  { %v500_v52 = vadd.f32 %v545_v50, %v499_v51  ;;  %v650_v53 = vpop.f32.mrb[5].mxu1 }
 0x3c0   :  { %v502_v54 = vpop.f32.mrb[6].mxu1 }
 0x3c1   :  { %505 = vst [vmem:[#allocation11] sm:$0xff] %v500_v52  ;;  %v651_v55 = vpop.f32.mrb[7].mxu1 }
 0x3c2   :  { %809 = shalt.err (!%p806_p2)
}
 0x3c3   :  { %s810_s8 = scalar_lea.hbm %s1027_s9, 128 }
 0x3c4   :  { %p811_p3 = scmp.ne.s32.totalorder %s1027_s9, %s810_s8  ;;  %p814_p4 = scmp.lt.u32.totalorder %s810_s8, %s1027_s9 }
 0x3c6   :  { %p816_p5 = pnand %p814_p4, %p811_p3 }
 0x3c8   :  { %819 = shalt.err (!%p816_p5)
}
 0x3c9   :  { %515 = dma.vmem_to_hbm [thread:$0]  %s513_s12, 128, %s1027_s9, [#allocation4]  }
 0x3ca   :  { %826 = dma.done.wait [#allocation4], 128  }
 0x3cb   :  { %827 = vsyncadd [#allocation4], 4294967168 }
 0x3cc   :  { %519 = vsyncpa [#allocation3], 1 }
 0x3cd   :  { %520 = vsyncpa [#allocation6], 1 }
 0x3ce   :  { %521 = vsyncpa [#allocation9], 1 }
 0x3cf   :  { %522 = vsyncpa [#allocation4], 1 }

</bundles_post_ra>
